<compile_context>
chip_gen: v6e
topology: v6e:2x2x1
jax: 0.10.0
libtpu: 0.0.40
codegen_flags: <defaults>
</compile_context>

<pallas_src>
import functools

import jax
import jax.numpy as jnp
from jax.experimental import pallas as pl
from jax.experimental.pallas import tpu as pltpu

TINY_NUMBER = 1e-6
_LANE = 128
_MAX_TILE_RAYS = 16384  # rays (lanes) per grid step; multiple of 128


def _round_up(x, m):
    return (x + m - 1) // m * m


def _mse_masked_kernel(pred_ref, gt_ref, mask_ref, loss_ref, num_acc, den_acc,
                       *, n_channels):
    i = pl.program_id(0)

    @pl.when(i == 0)
    def _():
        num_acc[...] = jnp.zeros_like(num_acc)
        den_acc[...] = jnp.zeros_like(den_acc)

    d = pred_ref[...] - gt_ref[...]          # (C, tile)
    m = mask_ref[...]                        # (1, tile) -> broadcast over channels
    num_acc[...] += d * d * m
    den_acc[...] += m

    @pl.when(i == pl.num_programs(0) - 1)
    def _():
        loss_ref[0, 0] = jnp.sum(num_acc[...]) / (
            jnp.sum(den_acc[...]) * n_channels + TINY_NUMBER
        )


def _mse_unmasked_kernel(pred_ref, gt_ref, loss_ref, num_acc, *, total_elems):
    i = pl.program_id(0)

    @pl.when(i == 0)
    def _():
        num_acc[...] = jnp.zeros_like(num_acc)

    d = pred_ref[...] - gt_ref[...]
    num_acc[...] += d * d

    @pl.when(i == pl.num_programs(0) - 1)
    def _():
        loss_ref[0, 0] = jnp.sum(num_acc[...]) / total_elems


def img2mse_pallas(pred_rgb, gt_rgb, mask=None, *, max_tile=_MAX_TILE_RAYS):
    """Masked MSE loss, computed in a Pallas TPU kernel. Returns f32 scalar."""
    pred = pred_rgb.astype(jnp.float32).reshape(-1, pred_rgb.shape[-1])
    gt = gt_rgb.astype(jnp.float32).reshape(-1, gt_rgb.shape[-1])
    n_rays, n_ch = pred.shape
    use_mask = mask is not None

    # Lane-dense layout: channels on sublanes, rays on the 128-wide lane axis.
    pred_t = pred.T                    # [C, N]
    gt_t = gt.T

    tile = min(max_tile, _round_up(n_rays, _LANE))
    n_pad = _round_up(n_rays, tile)
    pad = n_pad - n_rays
    if pad:
        # Zero padding is exact: padded diffs are 0 and padded mask is 0.
        pred_t = jnp.pad(pred_t, ((0, 0), (0, pad)))
        gt_t = jnp.pad(gt_t, ((0, 0), (0, pad)))

    grid = (n_pad // tile,)
    ray_spec = pl.BlockSpec((n_ch, tile), lambda i: (0, i))

    if use_mask:
        mask_t = mask.astype(jnp.float32).reshape(1, n_rays)
        if pad:
            mask_t = jnp.pad(mask_t, ((0, 0), (0, pad)))

        kernel = functools.partial(_mse_masked_kernel, n_channels=n_ch)
        loss = pl.pallas_call(
            kernel,
            out_shape=jax.ShapeDtypeStruct((1, 1), jnp.float32),
            grid_spec=pltpu.PrefetchScalarGridSpec(
                num_scalar_prefetch=0,
                grid=grid,
                in_specs=[
                    ray_spec,
                    ray_spec,
                    pl.BlockSpec((1, tile), lambda i: (0, i)),
                ],
                out_specs=pl.BlockSpec(memory_space=pltpu.SMEM),
                scratch_shapes=[
                    pltpu.VMEM((n_ch, tile), jnp.float32),  # numerator accumulator
                    pltpu.VMEM((1, tile), jnp.float32),     # mask-sum accumulator
                ],
            ),
            compiler_params=pltpu.CompilerParams(
                dimension_semantics=("arbitrary",),  # sequential reduction axis
            ),
        )(pred_t, gt_t, mask_t)
    else:
        kernel = functools.partial(
            _mse_unmasked_kernel, total_elems=n_rays * n_ch
        )
        loss = pl.pallas_call(
            kernel,
            out_shape=jax.ShapeDtypeStruct((1, 1), jnp.float32),
            grid_spec=pltpu.PrefetchScalarGridSpec(
                num_scalar_prefetch=0,
                grid=grid,
                in_specs=[ray_spec, ray_spec],
                out_specs=pl.BlockSpec(memory_space=pltpu.SMEM),
                scratch_shapes=[
                    pltpu.VMEM((n_ch, tile), jnp.float32),  # numerator accumulator
                ],
            ),
            compiler_params=pltpu.CompilerParams(
                dimension_semantics=("arbitrary",),
            ),
        )(pred_t, gt_t)

    return loss[0, 0]


class Criterion:
    """JAX/Pallas port of gnt/criterion.py::Criterion."""

    def __call__(self, outputs, ray_batch, scalars_to_log):
        pred_rgb = outputs["rgb"]
        pred_mask = outputs["mask"].astype(jnp.float32) if "mask" in outputs else None
        gt_rgb = ray_batch["rgb"]
        loss = img2mse_pallas(pred_rgb, gt_rgb, pred_mask)
        return loss, scalars_to_log


def _img2mse_ref(x, y, mask=None):
    if mask is None:
        return jnp.mean((x - y) ** 2)
    return jnp.sum((x - y) ** 2 * mask[..., None]) / (
        jnp.sum(mask) * x.shape[-1] + TINY_NUMBER
    )


if __name__ == "__main__":
    key = jax.random.PRNGKey(0)
    k1, k2, k3 = jax.random.split(key, 3)

    n_rays, n_channels = 256, 3
    pred_rgb = jax.random.uniform(k1, (n_rays, n_channels), dtype=jnp.float32)
    gt_rgb = jax.random.uniform(k2, (n_rays, n_channels), dtype=jnp.float32)
    mask = (jax.random.uniform(k3, (n_rays,)) > 0.3).astype(jnp.float32)

    criterion = Criterion()

    # masked path
    loss, scalars_to_log = criterion(
        {"rgb": pred_rgb, "mask": mask}, {"rgb": gt_rgb}, {}
    )
    loss = jax.block_until_ready(loss)
    ref = _img2mse_ref(pred_rgb, gt_rgb, mask)
    assert jnp.allclose(loss, ref, rtol=1e-5, atol=1e-6), (loss, ref)

    # unmasked path (no 'mask' key -> plain mean)
    loss2, _ = criterion({"rgb": pred_rgb}, {"rgb": gt_rgb}, {})
    loss2 = jax.block_until_ready(loss2)
    ref2 = _img2mse_ref(pred_rgb, gt_rgb, None)
    assert jnp.allclose(loss2, ref2, rtol=1e-5, atol=1e-6), (loss2, ref2)

    # non-multiple-of-128 ray count (exercises zero padding path)
    n2 = 200
    p2 = jax.random.uniform(k1, (n2, n_channels), dtype=jnp.float32)
    g2 = jax.random.uniform(k2, (n2, n_channels), dtype=jnp.float32)
    m2 = (jax.random.uniform(k3, (n2,)) > 0.5).astype(jnp.float32)
    l3 = jax.block_until_ready(img2mse_pallas(p2, g2, m2))
    assert jnp.allclose(l3, _img2mse_ref(p2, g2, m2), rtol=1e-5, atol=1e-6), l3
    l4 = jax.block_until_ready(img2mse_pallas(p2, g2, None))
    assert jnp.allclose(l4, _img2mse_ref(p2, g2, None), rtol=1e-5, atol=1e-6), l4

    print("KERNEL_OK")
</pallas_src>

<mosaic_0001>
module attributes {stable_mosaic.version = 11 : i64} {
  func.func @_mse_masked_kernel(%arg0: i32, %arg1: memref<3x256xf32, #tpu.memory_space<vmem>>, %arg2: memref<3x256xf32, #tpu.memory_space<vmem>>, %arg3: memref<1x256xf32, #tpu.memory_space<vmem>>, %arg4: memref<1x1xf32, #tpu.memory_space<smem>>, %arg5: memref<3x256xf32, #tpu.memory_space<vmem>>, %arg6: memref<1x256xf32, #tpu.memory_space<vmem>>) attributes {dimension_semantics = [#tpu.dimension_semantics<arbitrary>], iteration_bounds = array<i64: 1>, scalar_prefetch = 0 : i64, scratch_operands = 2 : i64, tpu.core_type = #tpu.core_type<tc>, window_params = [{transform_indices = @transform_0, window_bounds = array<i64: 3, 256>}, {transform_indices = @transform_1, window_bounds = array<i64: 3, 256>}, {transform_indices = @transform_2, window_bounds = array<i64: 1, 256>}, {transform_indices = @transform_3, window_bounds = array<i64: 1, 1>}]} {
    %c0_i32 = arith.constant 0 : i32
    %0 = arith.cmpi eq, %arg0, %c0_i32 : i32
    %1 = arith.extui %0 : i1 to i32
    %c0_i32_0 = arith.constant 0 : i32
    %2 = arith.cmpi ne, %1, %c0_i32_0 : i32
    scf.if %2 {
      %cst = arith.constant 0.000000e+00 : f32
      %19 = vector.broadcast %cst : f32 to vector<3x256xf32>
      %c0_16 = arith.constant 0 : index
      %c0_17 = arith.constant 0 : index
      %20 = vector.load %arg5[%c0_16, %c0_17] : memref<3x256xf32, #tpu.memory_space<vmem>>, vector<3x256xf32>
      tpu.vector_store %arg5[%c0_16, %c0_17], %19 {strides = array<i32>} : memref<3x256xf32, #tpu.memory_space<vmem>>, vector<3x256xf32>,
      %cst_18 = arith.constant 0.000000e+00 : f32
      %21 = vector.broadcast %cst_18 : f32 to vector<1x256xf32>
      %c0_19 = arith.constant 0 : index
      %c0_20 = arith.constant 0 : index
      %22 = vector.load %arg6[%c0_19, %c0_20] : memref<1x256xf32, #tpu.memory_space<vmem>>, vector<1x256xf32>
      tpu.vector_store %arg6[%c0_19, %c0_20], %21 {strides = array<i32>} : memref<1x256xf32, #tpu.memory_space<vmem>>, vector<1x256xf32>,
    } else {
    }
    %c0 = arith.constant 0 : index
    %c0_1 = arith.constant 0 : index
    %3 = vector.load %arg1[%c0, %c0_1] : memref<3x256xf32, #tpu.memory_space<vmem>>, vector<3x256xf32>
    %c0_2 = arith.constant 0 : index
    %c0_3 = arith.constant 0 : index
    %4 = vector.load %arg2[%c0_2, %c0_3] : memref<3x256xf32, #tpu.memory_space<vmem>>, vector<3x256xf32>
    %5 = arith.subf %3, %4 : vector<3x256xf32>
    %c0_4 = arith.constant 0 : index
    %c0_5 = arith.constant 0 : index
    %6 = vector.load %arg3[%c0_4, %c0_5] : memref<1x256xf32, #tpu.memory_space<vmem>>, vector<1x256xf32>
    %c0_6 = arith.constant 0 : index
    %c0_7 = arith.constant 0 : index
    %7 = vector.load %arg5[%c0_6, %c0_7] : memref<3x256xf32, #tpu.memory_space<vmem>>, vector<3x256xf32>
    %8 = arith.mulf %5, %5 : vector<3x256xf32>
    %9 = vector.broadcast %6 : vector<1x256xf32> to vector<3x256xf32>
    %10 = arith.mulf %8, %9 : vector<3x256xf32>
    %11 = arith.addf %7, %10 : vector<3x256xf32>
    %c0_8 = arith.constant 0 : index
    %c0_9 = arith.constant 0 : index
    %12 = vector.load %arg5[%c0_8, %c0_9] : memref<3x256xf32, #tpu.memory_space<vmem>>, vector<3x256xf32>
    tpu.vector_store %arg5[%c0_8, %c0_9], %11 {strides = array<i32>} : memref<3x256xf32, #tpu.memory_space<vmem>>, vector<3x256xf32>,
    %c0_10 = arith.constant 0 : index
    %c0_11 = arith.constant 0 : index
    %13 = vector.load %arg6[%c0_10, %c0_11] : memref<1x256xf32, #tpu.memory_space<vmem>>, vector<1x256xf32>
    %14 = arith.addf %13, %6 : vector<1x256xf32>
    %c0_12 = arith.constant 0 : index
    %c0_13 = arith.constant 0 : index
    %15 = vector.load %arg6[%c0_12, %c0_13] : memref<1x256xf32, #tpu.memory_space<vmem>>, vector<1x256xf32>
    tpu.vector_store %arg6[%c0_12, %c0_13], %14 {strides = array<i32>} : memref<1x256xf32, #tpu.memory_space<vmem>>, vector<1x256xf32>,
    %c0_i32_14 = arith.constant 0 : i32
    %16 = arith.cmpi eq, %arg0, %c0_i32_14 : i32
    %17 = arith.extui %16 : i1 to i32
    %c0_i32_15 = arith.constant 0 : i32
    %18 = arith.cmpi ne, %17, %c0_i32_15 : i32
    scf.if %18 {
      %c0_16 = arith.constant 0 : index
      %c0_17 = arith.constant 0 : index
      %19 = vector.load %arg5[%c0_16, %c0_17] : memref<3x256xf32, #tpu.memory_space<vmem>>, vector<3x256xf32>
      %20 = vector.shape_cast %19 : vector<3x256xf32> to vector<1x3x256xf32>
      %cst = arith.constant dense<0.000000e+00> : vector<1xf32>
      %21 = vector.multi_reduction <add>, %20, %cst [1, 2] : vector<1x3x256xf32> to vector<1xf32>
      %22 = vector.shape_cast %21 : vector<1xf32> to vector<1x1x1xf32>
      %23 = vector.extract %22[0, 0, 0] : f32 from vector<1x1x1xf32>
      %c0_18 = arith.constant 0 : index
      %c0_19 = arith.constant 0 : index
      %24 = vector.load %arg6[%c0_18, %c0_19] : memref<1x256xf32, #tpu.memory_space<vmem>>, vector<1x256xf32>
      %25 = vector.shape_cast %24 : vector<1x256xf32> to vector<1x1x256xf32>
      %cst_20 = arith.constant dense<0.000000e+00> : vector<1xf32>
      %26 = vector.multi_reduction <add>, %25, %cst_20 [1, 2] : vector<1x1x256xf32> to vector<1xf32>
      %27 = vector.shape_cast %26 : vector<1xf32> to vector<1x1x1xf32>
      %28 = vector.extract %27[0, 0, 0] : f32 from vector<1x1x1xf32>
      %cst_21 = arith.constant 3.000000e+00 : f32
      %29 = arith.mulf %28, %cst_21 : f32
      %cst_22 = arith.constant 9.99999997E-7 : f32
      %30 = arith.addf %29, %cst_22 : f32
      %31 = arith.divf %23, %30 : f32
      %c0_23 = arith.constant 0 : index
      %c0_24 = arith.constant 0 : index
      %32 = memref.load %arg4[%c0_23, %c0_24] : memref<1x1xf32, #tpu.memory_space<smem>>
      memref.store %31, %arg4[%c0_23, %c0_24] : memref<1x1xf32, #tpu.memory_space<smem>>
    } else {
    }
    return
  }
  func.func @transform_0(%arg0: i32) -> (i32, i32) {
    %c0_i32 = arith.constant 0 : i32
    %c0_i32_0 = arith.constant 0 : i32
    return %c0_i32, %arg0 : i32, i32
  }
  func.func @transform_1(%arg0: i32) -> (i32, i32) {
    %c0_i32 = arith.constant 0 : i32
    %c0_i32_0 = arith.constant 0 : i32
    return %c0_i32, %arg0 : i32, i32
  }
  func.func @transform_2(%arg0: i32) -> (i32, i32) {
    %c0_i32 = arith.constant 0 : i32
    %c0_i32_0 = arith.constant 0 : i32
    return %c0_i32, %arg0 : i32, i32
  }
  func.func @transform_3(%arg0: i32) -> (i32, i32) {
    %c0_i32 = arith.constant 0 : i32
    %c0_i32_0 = arith.constant 0 : i32
    %c0_i32_1 = arith.constant 0 : i32
    return %c0_i32, %c0_i32_0 : i32, i32
  }
}

</mosaic_0001>

<bundles_post_ra>
// kernel: tpu_custom_call.1
= control target key start
LH: loop header
LB: loop body
LE: loop exit
PB: predicated region body
PF: predicated region fallthrough
CT: control target
= control target key end

     0   :  { %8 = vsyncpa [#allocation5], 0  ;;  %s255_s0 = inlined_call_operand.hbm [shape: f32[3,256], index: 0, kind: input, shape index: {}]   ;;  %s256_s1 = inlined_call_operand.hbm [shape: f32[3,256], index: 1, kind: input, shape index: {}]   ;;  %s257_s2 = inlined_call_operand.vmem [shape: f32[1,256], index: 2, kind: input, shape index: {}]   ;;  %s258_s3 = inlined_call_operand.hbm [shape: f32[1,1], index: 3, kind: output, shape index: {}]  }
   0x1   :  { %9 = vsyncpa [#allocation8], 0 }
   0x2   :  { %10 = vsyncpa [#allocation6], 0  ;;  %s211_s12 = smov [#allocation4]   ;;  %s212_s14 = smov [#allocation7]  }
   0x3   :  { %s17_s13 = sshll.u32 %s211_s12, 4  ;;  %s27_s15 = sshll.u32 %s212_s14, 4  ;;  %s18_s13 = int_to_ptr.vmem [resolvable:$true] %s17_s13  ;;  %s28_s15 = int_to_ptr.vmem [resolvable:$true] %s27_s15 }
   0x4   :  { %s165_s16 = scalar_lea.vmem %s18_s13, 128  ;;  %p170_p1 = scmp.lt.s32.totalorder %s18_s13, %s18_s13 }
   0x5   :  { %p166_p0 = scmp.ne.s32.totalorder %s18_s13, %s165_s16  ;;  %p171_p2 = scmp.lt.s32.totalorder %s165_s16, %s165_s16 }
   0x7   :  { %p172_p3 = por %p171_p2, %p170_p1 }
   0x9   :  { %p173_p4 = pnand %p172_p3, %p166_p0 }
   0xb   :  { %176 = shalt.err (!%p173_p4)
}
   0xc   :  { %20 = dma.hbm_to_vmem [thread:$0]  %s255_s0, 128, %s18_s13, [#allocation5]  }
   0xd   :  { %s185_s19 = scalar_lea.vmem %s28_s15, 128  ;;  %p190_p6 = scmp.lt.s32.totalorder %s28_s15, %s28_s15 }
   0xe   :  { %p186_p5 = scmp.ne.s32.totalorder %s28_s15, %s185_s19  ;;  %p191_p7 = scmp.lt.s32.totalorder %s185_s19, %s185_s19 }
  0x10   :  { %p192_p8 = por %p191_p7, %p190_p6 }
  0x12   :  { %p193_p9 = pnand %p192_p8, %p186_p5 }
  0x14   :  { %196 = shalt.err (!%p193_p9)
}
  0x15   :  { %30 = dma.hbm_to_vmem [thread:$0]  %s256_s1, 128, %s28_s15, [#allocation8]  }
  0x16   :  { %205 = dma.done.wait [#allocation5], 128  }
  0x17   :  { %206 = vsyncadd [#allocation5], 4294967168 }
  0x18   :  { %207 = dma.done.wait [#allocation8], 128  }
  0x19   :  { %208 = vsyncadd [#allocation8], 4294967168  ;;  %v44_v0 = vlaneseq  ;;  %v213_v1 = vmov 0.0   ;;  %v49_v6 = vld [vmem:[#allocation4] sm:$0x77]  ;;  %vm83_vm1 = vcmask 1042432  }
  0x1a   :  { %43 = vst [vmem:[#allocation2] sm:$0x77] %v213_v1  ;;  %v50_v7 = vld [vmem:[#allocation7] sm:$0x77]  ;;  %v52_v8 = vld [vmem:[%s257_s2] sm:$0x3] }
  0x1b   :  { %vm241_vm0 = vcmp.lt.s32.totalorder %v44_v0, 256  ;;  %v57_v3 = vshrl.u32 %v44_v0, 7  ;;  %v51_v9 = vsub.f32 %v49_v6, %v50_v7  ;;  %vm108_vm2 = vcmask 1040384   ;;  %s214_s27 = smov [#allocation9]  }
  0x1c   :  { %48 = vst.msk [vmem:[#allocation3] sm:$0x3] %vm241_vm0, %v213_v1 }
  0x1d   :  { %v58_v4 = vsub.s32 0, %v57_v3  ;;  %v62_v5 = vsub.s32 1, %v57_v3  ;;  %v54_v12 = vmul.f32 %v51_v9, %v51_v9 }
  0x1f   :  { %v59_v10 = vrot.slane %v52_v8, %v58_v4  ;;  %v63_v11 = vrot.slane %v52_v8, %v62_v5 }
  0x21   :  { %v64_v13 = vcombine.low %v59_v10, %v63_v11  ;;  %v53_v15 = vld [vmem:[#allocation2] sm:$0x77] }
  0x23   :  { %v69_v14 = vld [vmem:[#allocation3] sm:$0x3]  ;;  %v66_v17 = vmul.f32 %v64_v13, %v54_v12 }
  0x24   :  { %v70_v16 = vadd.f32 %v69_v14, %v52_v8 }
  0x25   :  { %v67_v18 = vadd.f32 %v66_v17, %v53_v15 }
  0x26   :  { %75 = vst.msk [vmem:[#allocation3] sm:$0x3] %vm241_vm0, %v70_v16 }
  0x27   :  { %68 = vst [vmem:[#allocation2] sm:$0x77] %v67_v18 }
  0x2d   :  { %v96_v19 = vld [vmem:[#allocation3] sm:$0x3] }
  0x2e   :  { %v101_v20 = vrot.slane %v96_v19, %v58_v4  ;;  %v105_v21 = vrot.slane %v96_v19, %v62_v5  ;;  %v79_v22 = vld [vmem:[#allocation2] sm:$0x77] }
  0x2f   :  { %v81_v23 = vcombine.high %v79_v22, %v79_v22  ;;  %v84_v24 = vsel %vm83_vm1, %v79_v22, 0.0 }
  0x30   :  { %v109_v26 = vsel %vm108_vm2, %v101_v20, 0.0  ;;  %v110_v27 = vsel %vm108_vm2, %v105_v21, 0.0 }
  0x31   :  { %v85_v25 = vsel %vm83_vm1, %v81_v23, 0.0  ;;  %v111_v29 = vadd.f32 %v110_v27, %v109_v26 }
  0x32   :  { %v86_v28 = vadd.f32 %v85_v25, %v84_v24 }
  0x34   :  { %87 = vadd.xlane.f32.xlu0 %v86_v28 }
  0x38   :  { %112 = vadd.xlane.f32.xlu0 %v111_v29 }
  0xbd   :  { %v88_v30 = vpop.xlane.xlu0 %87 }
  0xbe   :  { %v89_v31 = vrot.slane %v88_v30, 4 }
  0xc0   :  { %v90_v32 = vadd.f32 %v89_v31, %v88_v30 }
  0xc1   :  { %v113_v33 = vpop.xlane.xlu0 %112 }
  0xc2   :  { %v91_v34 = vrot.slane %v90_v32, 2  ;;  %v114_v35 = vrot.slane %v113_v33, 4 }
  0xc4   :  { %v115_v36 = vadd.f32 %v114_v35, %v113_v33  ;;  %v92_v37 = vadd.f32 %v91_v34, %v90_v32 }
  0xc6   :  { %v116_v38 = vrot.slane %v115_v36, 2  ;;  %v93_v39 = vrot.slane %v92_v37, 1 }
  0xc8   :  { %v117_v40 = vadd.f32 %v116_v38, %v115_v36  ;;  %v94_v41 = vadd.f32 %v93_v39, %v92_v37 }
  0xca   :  { %144 = vpush %v94_v41  ;;  %v118_v42 = vrot.slane %v117_v40, 1 }
  0xcc   :  { %v119_v43 = vadd.f32 %v118_v42, %v117_v40 }
  0xce   :  { %146 = vpush %v119_v43 }
  0xfb   :  { %s145_s2 = spop %144 }
  0xff   :  { %s147_s22 = spop %146 }
 0x100   :  { %s121_s23 = smul.f32 3.0, %s147_s22 }
 0x102   :  { %s122_s24 = sadd.f32 1e-06, %s121_s23 }
 0x104   :  { %v123_v44 = vstv %s122_s24 }
 0x105   :  { %155 = vrcp.f32 %v123_v44 }
 0x112   :  { %v156_v45 = vpop.eup %155 }
 0x113   :  { %148 = vpush %v156_v45 }
 0x144   :  { %s149_s25 = spop %148 }
 0x145   :  { %s126_s26 = smul.f32 %s149_s25, %s145_s2 }
 0x147   :  { %128 = sst [smem:[#allocation9]] %s126_s26 }
 0x148   :  { %136 = dma.smem_to_hbm %s214_s27, 16, %s258_s3, [#allocation6]  }
 0x149   :  { %209 = dma.done.wait [#allocation6], 16  }
 0x14a   :  { %210 = vsyncadd [#allocation6], 4294967280 }
 0x14b   :  { %140 = sfence }
 0x14c   :  { %141 = vsyncpa [#allocation5], 1 }
 0x14d   :  { %142 = vsyncpa [#allocation8], 1 }
 0x14e   :  { %143 = vsyncpa [#allocation6], 1 }

</bundles_post_ra>
